<compile_context>
chip_gen: v6e
topology: v6e:2x2x1
jax: 0.10.0
libtpu: 0.0.40
codegen_flags: <defaults>
</compile_context>

<pallas_src>
import functools

import jax
import jax.numpy as jnp
from jax.experimental import pallas as pl
from jax.experimental.pallas import tpu as pltpu


def _log_sigmoid(x):
    # single-branch numerically stable log(sigmoid(x)) == min(x,0) - log1p(exp(-|x|))
    return jnp.minimum(x, 0.0) - jnp.log1p(jnp.exp(-jnp.abs(x)))


def _sgns_loss_kernel(labels_ref, in_emb_ref, out_emb_ref, loss_ref, *, C, N):
    """labels_ref: [TB, 1+C+N] int32, tables: [V, E] f32, loss_ref: [1, TB] f32."""
    TB = labels_ref.shape[0]
    V = in_emb_ref.shape[0]

    labels = labels_ref[...]                                     # [TB, 1+C+N]
    vocab_iota = jax.lax.broadcasted_iota(jnp.int32, (TB, V), 1)  # [TB, V]

    # center one-hot: [TB, V]
    center_onehot = (labels[:, 0:1] == vocab_iota).astype(jnp.float32)

    # count matrices: accumulate int compares (VPU), cast once at the end.
    ctx_counts = jnp.zeros((TB, V), jnp.int32)
    for c in range(C):                                            # C small & static
        ctx_counts = ctx_counts + (labels[:, 1 + c:2 + c] == vocab_iota).astype(jnp.int32)
    neg_counts = jnp.zeros((TB, V), jnp.int32)
    for n in range(N):                                            # N small & static
        neg_counts = neg_counts + (labels[:, 1 + C + n:2 + C + n] == vocab_iota).astype(jnp.int32)

    stacked_counts = jnp.concatenate([ctx_counts, neg_counts], axis=0).astype(jnp.float32)  # [2TB, V]

    # exactly two MXU matmuls per tile
    center_emb = jnp.dot(center_onehot, in_emb_ref[...],
                         preferred_element_type=jnp.float32)       # [TB, E]
    summed_emb = jnp.dot(stacked_counts, out_emb_ref[...],
                         preferred_element_type=jnp.float32)       # [2TB, E]

    # sum_c dot(out_emb[ctx[b,c]], center_emb[b]) == dot(sum_c out_emb[ctx[b,c]], center_emb[b])
    ctx_score = jnp.sum(summed_emb[:TB] * center_emb, axis=-1)     # [TB]
    neg_score = jnp.sum(summed_emb[TB:] * center_emb, axis=-1)     # [TB]

    loss = -(_log_sigmoid(ctx_score) + _log_sigmoid(-neg_score))   # [TB]
    loss_ref[...] = loss.reshape(1, TB)                            # lane-dense store


def embedding_model_forward(center, ctx, neg, in_emb, out_emb):
    """center:[B] int, ctx:[B,C] int, neg:[B,N] int, tables:[V,E] f32 -> loss [B] f32."""
    B = center.shape[0]
    C = ctx.shape[1]
    N = neg.shape[1]
    V, E = in_emb.shape
    W = 1 + C + N

    # single packed label tensor [B, 1+C+N]
    labels = jnp.concatenate(
        [center.reshape(B, 1).astype(jnp.int32),
         ctx.astype(jnp.int32),
         neg.astype(jnp.int32)], axis=1)

    # batch tiling: TB rows per grid step (sublane-aligned; 128 for large batches)
    if B >= 128:
        TB = 128
    else:
        TB = ((B + 7) // 8) * 8
    n_tiles = pl.cdiv(B, TB)
    B_pad = n_tiles * TB
    if B_pad != B:
        labels = jnp.pad(labels, ((0, B_pad - B), (0, 0)))   # pad rows use label 0 (valid)

    # VMEM budget with headroom (tables single-copy via constant index_map,
    # labels/output double-buffered, plus [TB,V] working set); capped < v7x physical.
    est = (2 * V * E * 4                 # two resident tables
           + 2 * TB * W * 4              # labels (double buffered)
           + 2 * TB * 4                  # loss output
           + 8 * TB * V * 4              # one-hot / count working set
           + 8 * TB * E * 4)             # embedding intermediates
    vmem_limit = int(min(48 * 1024 * 1024, max(32 * 1024 * 1024, 2 * est)))

    kernel = functools.partial(_sgns_loss_kernel, C=C, N=N)

    loss_row = pl.pallas_call(
        kernel,
        out_shape=jax.ShapeDtypeStruct((1, B_pad), jnp.float32),
        grid=(n_tiles,),
        in_specs=[
            pl.BlockSpec((TB, W), lambda i: (i, 0)),   # packed labels, batch-tiled
            pl.BlockSpec((V, E), lambda i: (0, 0)),    # input_embedding.weight (resident)
            pl.BlockSpec((V, E), lambda i: (0, 0)),    # output_embedding.weight (resident)
        ],
        out_specs=pl.BlockSpec((1, TB), lambda i: (0, i)),   # lane-dense loss
        compiler_params=pltpu.CompilerParams(
            dimension_semantics=("parallel",),
            vmem_limit_bytes=vmem_limit,
        ),
    )(labels, in_emb, out_emb)

    return loss_row[0, :B]


def _reference_forward(center, ctx, neg, in_emb, out_emb):
    ce = in_emb[center]                                   # [B, E]
    cw = out_emb[ctx]                                     # [B, C, E]
    nw = out_emb[neg]                                     # [B, N, E]
    ctx_prob = jnp.einsum("bce,be->bc", cw, ce).sum(axis=1)
    neg_prob = jnp.einsum("bne,be->bn", nw, ce).sum(axis=1)
    return -(jax.nn.log_sigmoid(ctx_prob) + jax.nn.log_sigmoid(-neg_prob))


if __name__ == "__main__":
    vocab_size, embed_size = 64, 32
    batch, window_size, K = 8, 2, 3
    C = window_size * 2          # context words per center word
    N = C * K                    # negative samples per center word

    key = jax.random.PRNGKey(0)
    k1, k2, k3, k4, k5 = jax.random.split(key, 5)

    # deterministic parameter init, mirroring embed_weight_init(): uniform(-0.1, 0.1)
    initrange = 0.1
    in_emb = jax.random.uniform(k1, (vocab_size, embed_size), jnp.float32,
                                -initrange, initrange)
    out_emb = jax.random.uniform(k2, (vocab_size, embed_size), jnp.float32,
                                 -initrange, initrange)

    center = jax.random.randint(k3, (batch,), 0, vocab_size, dtype=jnp.int32)
    ctx = jax.random.randint(k4, (batch, C), 0, vocab_size, dtype=jnp.int32)
    neg = jax.random.randint(k5, (batch, N), 0, vocab_size, dtype=jnp.int32)

    loss = embedding_model_forward(center, ctx, neg, in_emb, out_emb)
    jax.block_until_ready(loss)

    ref = _reference_forward(center, ctx, neg, in_emb, out_emb)
    assert loss.shape == (batch,)
    assert jnp.allclose(loss, ref, atol=1e-5, rtol=1e-5), (loss, ref)
    print("KERNEL_OK")
</pallas_src>

<mosaic_0001>
module attributes {stable_mosaic.version = 11 : i64} {
  func.func @_sgns_loss_kernel(%arg0: i32, %arg1: memref<8x17xi32, #tpu.memory_space<vmem>>, %arg2: memref<64x32xf32, #tpu.memory_space<vmem>>, %arg3: memref<64x32xf32, #tpu.memory_space<vmem>>, %arg4: memref<1x8xf32, #tpu.memory_space<vmem>>) attributes {dimension_semantics = [#tpu.dimension_semantics<parallel>], iteration_bounds = array<i64: 1>, scalar_prefetch = 0 : i64, scratch_operands = 0 : i64, tpu.core_type = #tpu.core_type<tc>, window_params = [{transform_indices = @transform_0, window_bounds = array<i64: 8, 17>}, {pipeline_mode = #tpu.pipeline_mode<synchronous>, transform_indices = @transform_1, window_bounds = array<i64: 64, 32>}, {pipeline_mode = #tpu.pipeline_mode<synchronous>, transform_indices = @transform_2, window_bounds = array<i64: 64, 32>}, {transform_indices = @transform_3, window_bounds = array<i64: 1, 8>}]} {
    %c0 = arith.constant 0 : index
    %c0_0 = arith.constant 0 : index
    %0 = vector.load %arg1[%c0, %c0_0] : memref<8x17xi32, #tpu.memory_space<vmem>>, vector<8x17xi32>
    %1 = tpu.iota {dimensions = array<i32: 1>} : vector<8x64xi32>
    %2 = vector.extract_strided_slice %0 {offsets = [0, 0], sizes = [8, 1], strides = [1, 1]} : vector<8x17xi32> to vector<8x1xi32>
    %3 = vector.broadcast %2 : vector<8x1xi32> to vector<8x64xi32>
    %4 = arith.cmpi eq, %3, %1 : vector<8x64xi32>
    %5 = arith.extui %4 : vector<8x64xi1> to vector<8x64xi32>
    %6 = arith.sitofp %5 : vector<8x64xi32> to vector<8x64xf32>
    %c0_i32 = arith.constant 0 : i32
    %7 = vector.broadcast %c0_i32 : i32 to vector<8x64xi32>
    %8 = vector.extract_strided_slice %0 {offsets = [0, 1], sizes = [8, 1], strides = [1, 1]} : vector<8x17xi32> to vector<8x1xi32>
    %9 = vector.broadcast %8 : vector<8x1xi32> to vector<8x64xi32>
    %10 = arith.cmpi eq, %9, %1 : vector<8x64xi32>
    %11 = arith.extui %10 : vector<8x64xi1> to vector<8x64xi32>
    %12 = arith.addi %7, %11 : vector<8x64xi32>
    %13 = vector.extract_strided_slice %0 {offsets = [0, 2], sizes = [8, 1], strides = [1, 1]} : vector<8x17xi32> to vector<8x1xi32>
    %14 = vector.broadcast %13 : vector<8x1xi32> to vector<8x64xi32>
    %15 = arith.cmpi eq, %14, %1 : vector<8x64xi32>
    %16 = arith.extui %15 : vector<8x64xi1> to vector<8x64xi32>
    %17 = arith.addi %12, %16 : vector<8x64xi32>
    %18 = vector.extract_strided_slice %0 {offsets = [0, 3], sizes = [8, 1], strides = [1, 1]} : vector<8x17xi32> to vector<8x1xi32>
    %19 = vector.broadcast %18 : vector<8x1xi32> to vector<8x64xi32>
    %20 = arith.cmpi eq, %19, %1 : vector<8x64xi32>
    %21 = arith.extui %20 : vector<8x64xi1> to vector<8x64xi32>
    %22 = arith.addi %17, %21 : vector<8x64xi32>
    %23 = vector.extract_strided_slice %0 {offsets = [0, 4], sizes = [8, 1], strides = [1, 1]} : vector<8x17xi32> to vector<8x1xi32>
    %24 = vector.broadcast %23 : vector<8x1xi32> to vector<8x64xi32>
    %25 = arith.cmpi eq, %24, %1 : vector<8x64xi32>
    %26 = arith.extui %25 : vector<8x64xi1> to vector<8x64xi32>
    %27 = arith.addi %22, %26 : vector<8x64xi32>
    %c0_i32_1 = arith.constant 0 : i32
    %28 = vector.broadcast %c0_i32_1 : i32 to vector<8x64xi32>
    %29 = vector.extract_strided_slice %0 {offsets = [0, 5], sizes = [8, 1], strides = [1, 1]} : vector<8x17xi32> to vector<8x1xi32>
    %30 = vector.broadcast %29 : vector<8x1xi32> to vector<8x64xi32>
    %31 = arith.cmpi eq, %30, %1 : vector<8x64xi32>
    %32 = arith.extui %31 : vector<8x64xi1> to vector<8x64xi32>
    %33 = arith.addi %28, %32 : vector<8x64xi32>
    %34 = vector.extract_strided_slice %0 {offsets = [0, 6], sizes = [8, 1], strides = [1, 1]} : vector<8x17xi32> to vector<8x1xi32>
    %35 = vector.broadcast %34 : vector<8x1xi32> to vector<8x64xi32>
    %36 = arith.cmpi eq, %35, %1 : vector<8x64xi32>
    %37 = arith.extui %36 : vector<8x64xi1> to vector<8x64xi32>
    %38 = arith.addi %33, %37 : vector<8x64xi32>
    %39 = vector.extract_strided_slice %0 {offsets = [0, 7], sizes = [8, 1], strides = [1, 1]} : vector<8x17xi32> to vector<8x1xi32>
    %40 = vector.broadcast %39 : vector<8x1xi32> to vector<8x64xi32>
    %41 = arith.cmpi eq, %40, %1 : vector<8x64xi32>
    %42 = arith.extui %41 : vector<8x64xi1> to vector<8x64xi32>
    %43 = arith.addi %38, %42 : vector<8x64xi32>
    %44 = vector.extract_strided_slice %0 {offsets = [0, 8], sizes = [8, 1], strides = [1, 1]} : vector<8x17xi32> to vector<8x1xi32>
    %45 = vector.broadcast %44 : vector<8x1xi32> to vector<8x64xi32>
    %46 = arith.cmpi eq, %45, %1 : vector<8x64xi32>
    %47 = arith.extui %46 : vector<8x64xi1> to vector<8x64xi32>
    %48 = arith.addi %43, %47 : vector<8x64xi32>
    %49 = vector.extract_strided_slice %0 {offsets = [0, 9], sizes = [8, 1], strides = [1, 1]} : vector<8x17xi32> to vector<8x1xi32>
    %50 = vector.broadcast %49 : vector<8x1xi32> to vector<8x64xi32>
    %51 = arith.cmpi eq, %50, %1 : vector<8x64xi32>
    %52 = arith.extui %51 : vector<8x64xi1> to vector<8x64xi32>
    %53 = arith.addi %48, %52 : vector<8x64xi32>
    %54 = vector.extract_strided_slice %0 {offsets = [0, 10], sizes = [8, 1], strides = [1, 1]} : vector<8x17xi32> to vector<8x1xi32>
    %55 = vector.broadcast %54 : vector<8x1xi32> to vector<8x64xi32>
    %56 = arith.cmpi eq, %55, %1 : vector<8x64xi32>
    %57 = arith.extui %56 : vector<8x64xi1> to vector<8x64xi32>
    %58 = arith.addi %53, %57 : vector<8x64xi32>
    %59 = vector.extract_strided_slice %0 {offsets = [0, 11], sizes = [8, 1], strides = [1, 1]} : vector<8x17xi32> to vector<8x1xi32>
    %60 = vector.broadcast %59 : vector<8x1xi32> to vector<8x64xi32>
    %61 = arith.cmpi eq, %60, %1 : vector<8x64xi32>
    %62 = arith.extui %61 : vector<8x64xi1> to vector<8x64xi32>
    %63 = arith.addi %58, %62 : vector<8x64xi32>
    %64 = vector.extract_strided_slice %0 {offsets = [0, 12], sizes = [8, 1], strides = [1, 1]} : vector<8x17xi32> to vector<8x1xi32>
    %65 = vector.broadcast %64 : vector<8x1xi32> to vector<8x64xi32>
    %66 = arith.cmpi eq, %65, %1 : vector<8x64xi32>
    %67 = arith.extui %66 : vector<8x64xi1> to vector<8x64xi32>
    %68 = arith.addi %63, %67 : vector<8x64xi32>
    %69 = vector.extract_strided_slice %0 {offsets = [0, 13], sizes = [8, 1], strides = [1, 1]} : vector<8x17xi32> to vector<8x1xi32>
    %70 = vector.broadcast %69 : vector<8x1xi32> to vector<8x64xi32>
    %71 = arith.cmpi eq, %70, %1 : vector<8x64xi32>
    %72 = arith.extui %71 : vector<8x64xi1> to vector<8x64xi32>
    %73 = arith.addi %68, %72 : vector<8x64xi32>
    %74 = vector.extract_strided_slice %0 {offsets = [0, 14], sizes = [8, 1], strides = [1, 1]} : vector<8x17xi32> to vector<8x1xi32>
    %75 = vector.broadcast %74 : vector<8x1xi32> to vector<8x64xi32>
    %76 = arith.cmpi eq, %75, %1 : vector<8x64xi32>
    %77 = arith.extui %76 : vector<8x64xi1> to vector<8x64xi32>
    %78 = arith.addi %73, %77 : vector<8x64xi32>
    %79 = vector.extract_strided_slice %0 {offsets = [0, 15], sizes = [8, 1], strides = [1, 1]} : vector<8x17xi32> to vector<8x1xi32>
    %80 = vector.broadcast %79 : vector<8x1xi32> to vector<8x64xi32>
    %81 = arith.cmpi eq, %80, %1 : vector<8x64xi32>
    %82 = arith.extui %81 : vector<8x64xi1> to vector<8x64xi32>
    %83 = arith.addi %78, %82 : vector<8x64xi32>
    %84 = vector.extract_strided_slice %0 {offsets = [0, 16], sizes = [8, 1], strides = [1, 1]} : vector<8x17xi32> to vector<8x1xi32>
    %85 = vector.broadcast %84 : vector<8x1xi32> to vector<8x64xi32>
    %86 = arith.cmpi eq, %85, %1 : vector<8x64xi32>
    %87 = arith.extui %86 : vector<8x64xi1> to vector<8x64xi32>
    %88 = arith.addi %83, %87 : vector<8x64xi32>
    %89 = tpu.concatenate %27, %88 in 0 : vector<8x64xi32>, vector<8x64xi32> -> vector<16x64xi32>
    %90 = arith.sitofp %89 : vector<16x64xi32> to vector<16x64xf32>
    %c0_2 = arith.constant 0 : index
    %c0_3 = arith.constant 0 : index
    %91 = vector.load %arg2[%c0_2, %c0_3] : memref<64x32xf32, #tpu.memory_space<vmem>>, vector<64x32xf32>
    %cst = arith.constant dense<0.000000e+00> : vector<8x32xf32>
    %92 = tpu.matmul %6, %91, %cst {dimension_numbers = #tpu.dot_dimension_numbers<[1], [0], [0], [1], [0, 0, 1, 1], [], []>} : vector<8x64xf32>, vector<64x32xf32>, vector<8x32xf32> -> vector<8x32xf32>
    %c0_4 = arith.constant 0 : index
    %c0_5 = arith.constant 0 : index
    %93 = vector.load %arg3[%c0_4, %c0_5] : memref<64x32xf32, #tpu.memory_space<vmem>>, vector<64x32xf32>
    %cst_6 = arith.constant dense<0.000000e+00> : vector<16x32xf32>
    %94 = tpu.matmul %90, %93, %cst_6 {dimension_numbers = #tpu.dot_dimension_numbers<[1], [0], [0], [1], [0, 0, 1, 1], [], []>} : vector<16x64xf32>, vector<64x32xf32>, vector<16x32xf32> -> vector<16x32xf32>
    %95 = vector.extract_strided_slice %94 {offsets = [0, 0], sizes = [8, 32], strides = [1, 1]} : vector<16x32xf32> to vector<8x32xf32>
    %96 = arith.mulf %95, %92 : vector<8x32xf32>
    %cst_7 = arith.constant dense<0.000000e+00> : vector<8xf32>
    %97 = vector.multi_reduction <add>, %96, %cst_7 [1] : vector<8x32xf32> to vector<8xf32>
    %98 = vector.extract_strided_slice %94 {offsets = [8, 0], sizes = [8, 32], strides = [1, 1]} : vector<16x32xf32> to vector<8x32xf32>
    %99 = arith.mulf %98, %92 : vector<8x32xf32>
    %cst_8 = arith.constant dense<0.000000e+00> : vector<8xf32>
    %100 = vector.multi_reduction <add>, %99, %cst_8 [1] : vector<8x32xf32> to vector<8xf32>
    %cst_9 = arith.constant 0.000000e+00 : f32
    %101 = vector.broadcast %cst_9 : f32 to vector<8xf32>
    %102 = arith.minimumf %97, %101 : vector<8xf32>
    %103 = math.absf %97 : vector<8xf32>
    %cst_10 = arith.constant 0.000000e+00 : f32
    %104 = vector.broadcast %cst_10 : f32 to vector<8xf32>
    %105 = arith.subf %104, %103 : vector<8xf32>
    %106 = math.exp %105 : vector<8xf32>
    %107 = math.log1p %106 : vector<8xf32>
    %108 = arith.subf %102, %107 : vector<8xf32>
    %cst_11 = arith.constant 0.000000e+00 : f32
    %109 = vector.broadcast %cst_11 : f32 to vector<8xf32>
    %110 = arith.subf %109, %100 : vector<8xf32>
    %cst_12 = arith.constant 0.000000e+00 : f32
    %111 = vector.broadcast %cst_12 : f32 to vector<8xf32>
    %112 = arith.minimumf %110, %111 : vector<8xf32>
    %113 = math.absf %110 : vector<8xf32>
    %cst_13 = arith.constant 0.000000e+00 : f32
    %114 = vector.broadcast %cst_13 : f32 to vector<8xf32>
    %115 = arith.subf %114, %113 : vector<8xf32>
    %116 = math.exp %115 : vector<8xf32>
    %117 = math.log1p %116 : vector<8xf32>
    %118 = arith.subf %112, %117 : vector<8xf32>
    %119 = arith.addf %108, %118 : vector<8xf32>
    %cst_14 = arith.constant 0.000000e+00 : f32
    %120 = vector.broadcast %cst_14 : f32 to vector<8xf32>
    %121 = arith.subf %120, %119 : vector<8xf32>
    %122 = vector.shape_cast %121 : vector<8xf32> to vector<1x8xf32>
    %c0_15 = arith.constant 0 : index
    %c0_16 = arith.constant 0 : index
    %123 = vector.load %arg4[%c0_15, %c0_16] : memref<1x8xf32, #tpu.memory_space<vmem>>, vector<1x8xf32>
    tpu.vector_store %arg4[%c0_15, %c0_16], %122 {strides = array<i32>} : memref<1x8xf32, #tpu.memory_space<vmem>>, vector<1x8xf32>,
    return
  }
  func.func @transform_0(%arg0: i32) -> (i32, i32) {
    %c0_i32 = arith.constant 0 : i32
    %c0_i32_0 = arith.constant 0 : i32
    return %arg0, %c0_i32 : i32, i32
  }
  func.func @transform_1(%arg0: i32) -> (i32, i32) {
    %c0_i32 = arith.constant 0 : i32
    %c0_i32_0 = arith.constant 0 : i32
    %c0_i32_1 = arith.constant 0 : i32
    return %c0_i32, %c0_i32_0 : i32, i32
  }
  func.func @transform_2(%arg0: i32) -> (i32, i32) {
    %c0_i32 = arith.constant 0 : i32
    %c0_i32_0 = arith.constant 0 : i32
    %c0_i32_1 = arith.constant 0 : i32
    return %c0_i32, %c0_i32_0 : i32, i32
  }
  func.func @transform_3(%arg0: i32) -> (i32, i32) {
    %c0_i32 = arith.constant 0 : i32
    %c0_i32_0 = arith.constant 0 : i32
    return %c0_i32, %arg0 : i32, i32
  }
}

</mosaic_0001>

<bundles_post_ra>
// kernel: tpu_custom_call.1
= control target key start
LH: loop header
LB: loop body
LE: loop exit
PB: predicated region body
PF: predicated region fallthrough
CT: control target
= control target key end

     0   :  { %v484_v1 = vmov 7   ;;  %v485_v2 = vmov 5   ;;  %s646_s0 = inlined_call_operand.vmem [shape: s32[8,17], index: 0, kind: input, shape index: {}]   ;;  %s647_s1 = inlined_call_operand.vmem [shape: f32[64,32], index: 1, kind: input, shape index: {}]   ;;  %s648_s2 = inlined_call_operand.vmem [shape: f32[64,32], index: 2, kind: input, shape index: {}]   ;;  %s649_s3 = inlined_call_operand.hbm [shape: f32[1,8], index: 3, kind: output, shape index: {}]  }
   0x1   :  { %v527_v0 = vld [vmem:[%s646_s0] sm:$0xff]  ;;  %438 = vset.pattern.permute.xlu1 %v484_v1  ;;  %436 = vset.pattern.permute.xlu0 %v485_v2 }
   0x2   :  { %8 = vsyncpa [#allocation3], 0  ;;  %59 = vperm.xlu1 %438, %v527_v0   ;;  %48 = vperm.xlu0 %436, %v527_v0   ;;  %v486_v3 = vmov 8   ;;  %v487_v4 = vmov 6   ;;  %v488_v5 = vmov 9   ;;  %v489_v6 = vmov 10  }
   0x3   :  { %v490_v7 = vmov 11   ;;  %v491_v8 = vmov 13   ;;  %v492_v9 = vmov 12   ;;  %v493_v10 = vmov 14   ;;  %v209_v15 = vld [vmem:[%s648_s2 + $0x38] sm:$0xff]  ;;  %v208_v18 = vld [vmem:[%s648_s2 + $0x30] sm:$0xff] }
   0x4   :  { %v494_v11 = vmov 1   ;;  %v495_v12 = vmov 4   ;;  %v496_v13 = vmov 2   ;;  %v497_v14 = vmov 16   ;;  %397 = vmatprep.subr.mxu1 %v209_v15  ;;  %v127_v17 = vld [vmem:[%s647_s1 + $0x38] sm:$0xff]  ;;  %v126_v19 = vld [vmem:[%s647_s1 + $0x30] sm:$0xff] }
   0x5   :  { %v498_v16 = vmov 0.0   ;;  %398 = vmatpush3.msra.mxu1 %v209_v15  ;;  %v207_v20 = vld [vmem:[%s648_s2 + $0x28] sm:$0xff]  ;;  %v499_v21 = vmov 3   ;;  %v206_v23 = vld [vmem:[%s648_s2 + $0x20] sm:$0xff]  ;;  %v205_v25 = vld [vmem:[%s648_s2 + $0x18] sm:$0xff]  ;;  %v500_v26 = vmov 15   ;;  %v16_v37 = vlaneseq }
   0x6   :  { %439 = vset.pattern.permute.xlu1 %v486_v3  ;;  %437 = vset.pattern.permute.xlu0 %v487_v4  ;;  %v125_v22 = vld [vmem:[%s647_s1 + $0x28] sm:$0xff]  ;;  %v124_v24 = vld [vmem:[%s647_s1 + $0x20] sm:$0xff]  ;;  %v123_v27 = vld [vmem:[%s647_s1 + $0x18] sm:$0xff]  ;;  %v501_v34 = vmov 0   ;;  %vm502_vm0 = vmmov 0  }
   0x7   :  { %65 = vperm.xlu1 %439, %v527_v0   ;;  %53 = vperm.xlu0 %437, %v527_v0   ;;  %v204_v28 = vld [vmem:[%s648_s2 + $0x10] sm:$0xff]  ;;  %v203_v30 = vld [vmem:[%s648_s2 + $0x8] sm:$0xff]  ;;  %v202_v32 = vld [vmem:[%s648_s2] sm:$0xff]  ;;  %v605_v40 = vand.u32 127, %v16_v37 }
   0x8   :  { %378 = vmatprep.subr.mxu0 %v498_v16  ;;  %399 = vmatprep.subr.mxu1 %v208_v18  ;;  %v122_v29 = vld [vmem:[%s647_s1 + $0x10] sm:$0xff]  ;;  %v121_v31 = vld [vmem:[%s647_s1 + $0x8] sm:$0xff]  ;;  %v120_v33 = vld [vmem:[%s647_s1] sm:$0xff]  ;;  %s503_s1 = smov [#allocation2]  }
   0x9   :  { %379 = vmatpush3.msra.mxu0 %v127_v17  ;;  %400 = vmatpush3.msra.mxu1 %v208_v18  ;;  %s347_s2 = sshll.u32 %s503_s1, 4  ;;  %s348_s2 = int_to_ptr.vmem [resolvable:$true] %s347_s2 }
   0xa   :  { %380 = vmatprep.subr.mxu0 %v498_v16  ;;  %401 = vmatprep.subr.mxu1 %v207_v20  ;;  %s462_s17 = scalar_lea.vmem %s348_s2, 16  ;;  %s466_s18 = scalar_lea.vmem %s348_s2, 32 }
   0xb   :  { %440 = vset.pattern.permute.xlu1 %v488_v5  ;;  %441 = vset.pattern.permute.xlu0 %v489_v6  ;;  %p463_p0 = scmp.ne.s32.totalorder %s348_s2, %s462_s17  ;;  %p467_p1 = scmp.lt.s32.totalorder %s348_s2, %s348_s2 }
   0xc   :  { %71 = vperm.xlu1 %440, %v527_v0   ;;  %77 = vperm.xlu0 %441, %v527_v0   ;;  %p468_p2 = scmp.lt.s32.totalorder %s466_s18, %s462_s17 }
   0xd   :  { %381 = vmatpush3.msra.mxu0 %v126_v19  ;;  %402 = vmatpush3.msra.mxu1 %v207_v20 }
   0xe   :  { %382 = vmatprep.subr.mxu0 %v498_v16  ;;  %403 = vmatprep.subr.mxu1 %v206_v23  ;;  %p469_p3 = por %p468_p2, %p467_p1 }
   0xf   :  { %383 = vmatpush3.msra.mxu0 %v125_v22  ;;  %404 = vmatpush3.msra.mxu1 %v206_v23 }
  0x10   :  { %442 = vset.pattern.permute.xlu1 %v490_v7  ;;  %444 = vset.pattern.permute.xlu0 %v491_v8  ;;  %p470_p4 = pnand %p469_p3, %p463_p0 }
  0x11   :  { %83 = vperm.xlu1 %442, %v527_v0   ;;  %95 = vperm.xlu0 %444, %v527_v0  }
  0x12   :  { %384 = vmatprep.subr.mxu0 %v498_v16  ;;  %405 = vmatprep.subr.mxu1 %v205_v25 }
  0x13   :  { %385 = vmatpush3.msra.mxu0 %v124_v24  ;;  %406 = vmatpush3.msra.mxu1 %v205_v25 }
  0x14   :  { %386 = vmatprep.subr.mxu0 %v498_v16  ;;  %407 = vmatprep.subr.mxu1 %v204_v28 }
  0x15   :  { %443 = vset.pattern.permute.xlu1 %v492_v9  ;;  %447 = vset.pattern.permute.xlu0 %v493_v10 }
  0x16   :  { %89 = vperm.xlu1 %443, %v527_v0   ;;  %101 = vperm.xlu0 %447, %v527_v0  }
  0x17   :  { %387 = vmatpush3.msra.mxu0 %v123_v27  ;;  %408 = vmatpush3.msra.mxu1 %v204_v28 }
  0x18   :  { %388 = vmatprep.subr.mxu0 %v498_v16  ;;  %409 = vmatprep.subr.mxu1 %v203_v30 }
  0x19   :  { %389 = vmatpush3.msra.mxu0 %v122_v29  ;;  %410 = vmatpush3.msra.mxu1 %v203_v30 }
  0x1a   :  { %445 = vset.pattern.permute.xlu1 %v494_v11  ;;  %450 = vset.pattern.permute.xlu0 %v495_v12 }
  0x1b   :  { %25 = vperm.xlu1 %445, %v527_v0   ;;  %42 = vperm.xlu0 %450, %v527_v0  }
  0x1c   :  { %390 = vmatprep.subr.mxu0 %v498_v16  ;;  %411 = vmatprep.subr.mxu1 %v202_v32 }
  0x1d   :  { %391 = vmatpush3.msra.mxu0 %v121_v31  ;;  %412 = vmatpush3.msra.mxu1 %v202_v32 }
  0x1e   :  { %392 = vmatprep.subr.mxu0 %v498_v16  ;;  %394 = vmatprep.mubr.msk.f32.mxu0 %vm502_vm0, %v498_v16  ;;  %vm128_vm0 = vcmask 523264  }
  0x1f   :  { %446 = vset.pattern.permute.xlu1 %v496_v13  ;;  %453 = vset.pattern.permute.xlu0 %v497_v14 }
  0x20   :  { %30 = vperm.xlu1 %446, %v527_v0   ;;  %393 = vmatpush3.msra.mxu0 %v120_v33 }
  0x24   :  { %448 = vset.pattern.permute.xlu1 %v499_v21 }
  0x25   :  { %36 = vperm.xlu1 %448, %v527_v0  }
  0x29   :  { %449 = vset.pattern.permute.xlu1 %v500_v26 }
  0x2a   :  { %107 = vperm.xlu1 %449, %v527_v0  }
  0x2e   :  { %451 = vset.pattern.permute.xlu1 %v497_v14 }
  0x2f   :  { %113 = vperm.xlu1 %451, %v527_v0  }
  0x33   :  { %452 = vset.pattern.permute.xlu1 %v501_v34 }
  0x34   :  { %19 = vperm.xlu1 %452, %v527_v0  }
  0x7d   :  { %v60_v35 = vpop.permute.xlu1 %59  ;;  %v49_v36 = vpop.permute.xlu0 %48 }
  0x7e   :  { %vm50_vm1 = vcmp.eq.s32.totalorder %v49_v36, %v605_v40  ;;  %vm61_vm3 = vcmp.eq.s32.totalorder %v60_v35, %v605_v40 }
  0x7f   :  { %v51_v42 = vsel %vm50_vm1, 1, %v501_v34  ;;  %v62_v46 = vsel %vm61_vm3, 1, %v501_v34  ;;  %vm292_vm3 = vcmask 261120  }
  0x82   :  { %v66_v38 = vpop.permute.xlu1 %65  ;;  %v54_v39 = vpop.permute.xlu0 %53 }
  0x83   :  { %vm55_vm2 = vcmp.eq.s32.totalorder %v54_v39, %v605_v40  ;;  %vm67_vm4 = vcmp.eq.s32.totalorder %v66_v38, %v605_v40 }
  0x84   :  { %v56_v43 = vsel %vm55_vm2, 1, %v501_v34  ;;  %v68_v50 = vsel %vm67_vm4, 1, %v501_v34 }
  0x85   :  { %v57_v44 = vadd.s32 %v56_v43, %v51_v42 }
  0x87   :  { %v72_v41 = vpop.permute.xlu1 %71  ;;  %v78_v47 = vpop.permute.xlu0 %77  ;;  %v63_v48 = vadd.s32 %v62_v46, %v57_v44 }
  0x88   :  { %vm73_vm5 = vcmp.eq.s32.totalorder %v72_v41, %v605_v40  ;;  %vm79_vm6 = vcmp.eq.s32.totalorder %v78_v47, %v605_v40 }
  0x89   :  { %v69_v52 = vadd.s32 %v68_v50, %v63_v48  ;;  %v74_v53 = vsel %vm73_vm5, 1, %v501_v34  ;;  %v80_v56 = vsel %vm79_vm6, 1, %v501_v34  ;;  %vm339_vm6 = vcmask 57344  }
  0x8b   :  { %v75_v55 = vadd.s32 %v74_v53, %v69_v52 }
  0x8c   :  { %v84_v45 = vpop.permute.xlu1 %83  ;;  %v96_v51 = vpop.permute.xlu0 %95 }
  0x8d   :  { %vm85_vm7 = vcmp.eq.s32.totalorder %v84_v45, %v605_v40  ;;  %v81_v58 = vadd.s32 %v80_v56, %v75_v55  ;;  %vm97_vm11 = vcmp.eq.s32.totalorder %v96_v51, %v605_v40 }
  0x8e   :  { %v86_v60 = vsel %vm85_vm7, 1, %v501_v34  ;;  %v98_v5 = vsel %vm97_vm11, 1, %v501_v34 }
  0x8f   :  { %v87_v0 = vadd.s32 %v86_v60, %v81_v58 }
  0x91   :  { %v90_v49 = vpop.permute.xlu1 %89  ;;  %v102_v57 = vpop.permute.xlu0 %101 }
  0x92   :  { %vm91_vm8 = vcmp.eq.s32.totalorder %v90_v49, %v605_v40  ;;  %vm103_vm14 = vcmp.eq.s32.totalorder %v102_v57, %v605_v40 }
  0x93   :  { %v92_v62 = vsel %vm91_vm8, 1, %v501_v34  ;;  %v104_v12 = vsel %vm103_vm14, 1, %v501_v34 }
  0x94   :  { %v93_v3 = vadd.s32 %v92_v62, %v87_v0 }
  0x96   :  { %v26_v54 = vpop.permute.xlu1 %25  ;;  %v43_v61 = vpop.permute.xlu0 %42  ;;  %v99_v9 = vadd.s32 %v98_v5, %v93_v3 }
  0x97   :  { %vm27_vm10 = vcmp.eq.s32.totalorder %v26_v54, %v605_v40  ;;  %vm44_vm12 = vcmp.eq.s32.totalorder %v43_v61, %v605_v40  ;;  %v335_v61 = vshrl.u32 %v16_v37, 7 }
  0x98   :  { %v28_v1 = vsel %vm27_vm10, 1, %v501_v34  ;;  %v45_v7 = vsel %vm44_vm12, 1, %v501_v34  ;;  %v105_v15 = vadd.s32 %v104_v12, %v99_v9 }
  0x9b   :  { %v31_v59 = vpop.permute.xlu1 %30 }
  0x9c   :  { %vm32_vm9 = vcmp.eq.s32.totalorder %v31_v59, %v605_v40 }
  0x9d   :  { %v33_v63 = vsel %vm32_vm9, 1, %v501_v34 }
  0x9e   :  { %v34_v4 = vadd.s32 %v33_v63, %v28_v1 }
  0xa0   :  { %v37_v2 = vpop.permute.xlu1 %36 }
  0xa1   :  { %vm38_vm13 = vcmp.eq.s32.totalorder %v37_v2, %v605_v40  ;;  %v336_v2 = vsub.s32 %v605_v40, %v335_v61 }
  0xa2   :  { %v39_v6 = vsel %vm38_vm13, 1, %v501_v34 }
  0xa3   :  { %v40_v8 = vadd.s32 %v39_v6, %v34_v4 }
  0xa5   :  { %v108_v10 = vpop.permute.xlu1 %107  ;;  %v46_v11 = vadd.s32 %v45_v7, %v40_v8 }
  0xa6   :  { %vm109_vm15 = vcmp.eq.s32.totalorder %v108_v10, %v605_v40 }
  0xa7   :  { %v118_v13 = vcvt.s32.f32 %v46_v11  ;;  %v110_v14 = vsel %vm109_vm15, 1, %v501_v34 }
  0xa8   :  { %v111_v18 = vadd.s32 %v110_v14, %v105_v15 }
  0xa9   :  { %413 = vmatprep.mubr.msk.f32.mxu1 %vm128_vm0, %v118_v13 }
  0xaa   :  { %v114_v17 = vpop.permute.xlu1 %113 }
  0xab   :  { %vm115_vm1 = vcmp.eq.s32.totalorder %v114_v17, %v605_v40 }
  0xac   :  { %v116_v19 = vsel %vm115_vm1, 1, %v501_v34 }
  0xad   :  { %v117_v20 = vadd.s32 %v116_v19, %v111_v18 }
  0xaf   :  { %v119_v21 = vcvt.s32.f32 %v117_v20  ;;  %v20_v22 = vpop.permute.xlu1 %19 }
  0xb0   :  { %vm21_vm2 = vcmp.eq.s32.totalorder %v20_v22, %v605_v40 }
  0xb1   :  { %v355_v23 = vsel %vm21_vm2, 1.0, %v498_v16  ;;  %414 = vmatmul.mubr.msk.f32.vlgmr.msra.gmra.mxu1 %vm128_vm0, %v119_v21 }
  0xb2   :  { %395 = vmatmul.mubr.msk.f32.vlgmr.msra.gmra.mxu0 %vm128_vm0, %v355_v23 }
 0x171   :  { %v415_v24 = vpop.f32.mrf.mxu1 }
 0x172   :  { %v198_v25 = vpop.f32.mrf.mxu0 }
 0x173   :  { %v296_v26 = vmul.f32 %v415_v24, %v198_v25  ;;  %v282_v27 = vpop.f32.mrf.mxu1 }
 0x174   :  { %v291_v28 = vmul.f32 %v282_v27, %v198_v25  ;;  %v396_v29 = vpop.f32.mrf.mxu0 }
 0x175   :  { %v297_v30 = vsel %vm292_vm3, %v296_v26, 0.0 }
 0x176   :  { %298 = vadd.xlane.f32.xlu0 %v297_v30  ;;  %v293_v31 = vsel %vm292_vm3, %v291_v28, 0.0 }
 0x177   :  { %294 = vadd.xlane.f32.xlu1 %v293_v31 }
 0x1ff   :  { %v299_v32 = vpop.xlane.xlu0 %298 }
 0x200   :  { %v315_v33 = vsub.f32 0.0, %v299_v32  ;;  %v295_v34 = vpop.xlane.xlu1 %294 }
 0x201   :  { %v301_v35 = vand.u32 2147483647, %v295_v34  ;;  %v300_v58 = vmin.f32 %v295_v34, 0.0 }
 0x202   :  { %v317_v36 = vand.u32 2147483647, %v315_v33  ;;  %v316_v59 = vmin.f32 %v315_v33, 0.0 }
 0x203   :  { %v302_v38 = vsub.f32 0.0, %v301_v35 }
 0x204   :  { %v318_v16 = vsub.f32 0.0, %v317_v36 }
 0x205   :  { %v303_v39 = vmul.f32 1.442695, %v302_v38 }
 0x206   :  { %v319_v41 = vmul.f32 1.442695, %v318_v16 }
 0x207   :  { %454 = vpow2.f32 %v303_v39 }
 0x208   :  { %456 = vpow2.f32 %v319_v41 }
 0x214   :  { %v455_v42 = vpop.eup %454 }
 0x215   :  { %v457_v43 = vpop.eup %456  ;;  %v305_v44 = vadd.f32 1.0, %v455_v42  ;;  %v308_v46 = vmul.f32 -0.5, %v455_v42  ;;  %v311_v50 = vand.u32 2147483647, %v455_v42 }
 0x216   :  { %v321_v45 = vadd.f32 1.0, %v457_v43  ;;  %v324_v47 = vmul.f32 -0.5, %v457_v43  ;;  %v327_v51 = vand.u32 2147483647, %v457_v43 }
 0x217   :  { %458 = vlog2.f32 %v305_v44  ;;  %v309_v48 = vadd.f32 1.0, %v308_v46  ;;  %vm312_vm4 = vcmp.lt.f32.partialorder %v311_v50, 0.0004427343 }
 0x218   :  { %460 = vlog2.f32 %v321_v45  ;;  %v325_v49 = vadd.f32 1.0, %v324_v47  ;;  %vm328_vm5 = vcmp.lt.f32.partialorder %v327_v51, 0.0004427343 }
 0x219   :  { %v310_v55 = vmul.f32 %v455_v42, %v309_v48 }
 0x21a   :  { %v326_v57 = vmul.f32 %v457_v43, %v325_v49 }
 0x224   :  { %v459_v52 = vpop.eup %458 }
 0x225   :  { %v461_v53 = vpop.eup %460  ;;  %v307_v54 = vmul.f32 0.6931472, %v459_v52 }
 0x226   :  { %v323_v56 = vmul.f32 0.6931472, %v461_v53 }
 0x227   :  { %v313_v60 = vsel %vm312_vm4, %v310_v55, %v307_v54 }
 0x228   :  { %v329_v62 = vsel %vm328_vm5, %v326_v57, %v323_v56  ;;  %v314_v63 = vsub.f32 %v300_v58, %v313_v60 }
 0x229   :  { %v330_v0 = vsub.f32 %v316_v59, %v329_v62 }
 0x22b   :  { %v331_v1 = vadd.f32 %v330_v0, %v314_v63 }
 0x22d   :  { %v332_v3 = vsub.f32 0.0, %v331_v1 }
 0x22f   :  { %v337_v4 = vrot.slane %v332_v3, %v336_v2 }
 0x231   :  { %340 = vst.msk [vmem:[#allocation2] sm:$0x1] %vm339_vm6, %v337_v4 }
 0x232   :  { %473 = shalt.err (!%p470_p4)
}
 0x233   :  { %350 = dma.vmem_to_hbm [thread:$0]  %s348_s2, 16, %s649_s3, [#allocation3]  }
 0x234   :  { %482 = dma.done.wait [#allocation3], 16  }
 0x235   :  { %483 = vsyncadd [#allocation3], 4294967280 }
 0x236   :  { %354 = vsyncpa [#allocation3], 1 }

</bundles_post_ra>
